<compile_context>
chip_gen: v7x
topology: tpu7x:2x2x1
jax: 0.10.0
libtpu: 0.0.40
codegen_flags: <defaults>
</compile_context>

<pallas_src>
import functools

import jax
import jax.numpy as jnp
from jax import lax
from jax.experimental import pallas as pl
from jax.experimental.pallas import tpu as pltpu

_SELU_ALPHA = 1.6732632423543772
_SELU_SCALE = 1.0507009873554805


def _round_up(x, m):
    return ((x + m - 1) // m) * m


def _pick_m_tile(m_total, activation):
    # SELU epilogue (exp/where temps) roughly doubles the live vregs -> use a
    # 128-row tile so it stays in-register; 256 rows otherwise (32 f32 vregs).
    tile = 128 if activation == "selu" else 256
    # Prefer >= 4 grid steps so v7x's two TensorCores and the software
    # pipeline have work to overlap; never go below 128 rows.
    while tile > 128 and -(-m_total // tile) < 4:
        tile //= 2
    return tile


def _matmul_bias_act_kernel(x_ref, w_ref, b_ref, o_ref, *, activation):
    # x_ref: (TM, KKC_pad)   lane-dense im2col rows (compute dtype)
    # w_ref: (KKC_pad, Cpad) im2col weight matrix   (compute dtype)
    # b_ref: (1, Cpad)       bias, f32
    # o_ref: (TM, Cpad)      lane-dense output tile, f32
    acc = jnp.dot(x_ref[...], w_ref[...],
                  preferred_element_type=jnp.float32)     # (TM, Cpad) f32
    acc = acc + b_ref[...]                                # single bias broadcast
    if activation == "relu":
        acc = jnp.maximum(acc, 0.0)
    elif activation == "selu":
        acc = _SELU_SCALE * jnp.where(acc > 0.0, acc,
                                      _SELU_ALPHA * jnp.expm1(acc))
    o_ref[...] = acc.astype(o_ref.dtype)


def conv2d_pallas(x_nchw, weight, bias, *, activation="relu", stride=1,
                  compute_dtype=jnp.bfloat16):
    """Equivalent of Conv2D.forward: conv(k, s=1, p=(k-1)//2) + optional act.

    x_nchw : (N, Cin, H, W) float32   (PyTorch layout)
    weight : (Cout, Cin, K, K) float32
    bias   : (Cout,) float32
    returns: (N, Cout, H, W) float32
    """
    if activation not in ("relu", "selu", None):
        raise ValueError(f"unsupported activation: {activation!r}")
    if stride != 1:
        raise NotImplementedError("only stride=1 is implemented")
    N, Cin, H, W = x_nchw.shape
    Cout, Cin_w, K, K2 = weight.shape
    assert Cin_w == Cin and K == K2, "weight shape mismatch"
    if K % 2 == 0:
        raise NotImplementedError("'same' padding requires odd kernel_size here")
    pad = (K - 1) // 2

    csize = jnp.dtype(compute_dtype).itemsize
    KKC = K * K * Cin
    KKC_pad = _round_up(KKC, 128)                 # lane-dense contraction
    Cpad = _round_up(max(Cout, 128), 128)         # lane-dense output / accumulator
    M_total = N * H * W
    TM = _pick_m_tile(M_total, activation)
    M_pad = _round_up(M_total, TM)

    # ---- host-side im2col (fused XLA slices/concat/pad) -------------------
    # NCHW -> NHWC, zero 'same' padding, then stack the K*K shifted windows
    # side by side on the channel axis in (kh, kw, cin) order (matches the
    # weight matrix below).
    x = jnp.transpose(x_nchw, (0, 2, 3, 1))                     # (N, H, W, Cin)
    x = jnp.pad(x, ((0, 0), (pad, pad), (pad, pad), (0, 0)))
    taps = [x[:, kh:kh + H, kw:kw + W, :]
            for kh in range(K) for kw in range(K)]
    cols = jnp.concatenate(taps, axis=-1)                       # (N, H, W, KKC)
    cols = cols.reshape(M_total, KKC)
    cols = jnp.pad(cols, ((0, M_pad - M_total), (0, KKC_pad - KKC)))
    cols = cols.astype(compute_dtype)                           # (M_pad, KKC_pad)

    # (Cout, Cin, K, K) -> im2col weight matrix (K*K*Cin, Cout), zero padded.
    w_mat = jnp.transpose(weight, (2, 3, 1, 0)).reshape(KKC, Cout)
    w_mat = jnp.pad(w_mat, ((0, KKC_pad - KKC), (0, Cpad - Cout)))
    w_mat = w_mat.astype(compute_dtype)                         # (KKC_pad, Cpad)
    b_vec = jnp.pad(bias, (0, Cpad - Cout)).reshape(1, Cpad).astype(jnp.float32)

    kernel = functools.partial(_matmul_bias_act_kernel, activation=activation)

    # Explicit VMEM budget: double-buffered LHS/out blocks + weights + bias,
    # clamped to a v7x-safe 40 MiB of the 64 MiB/TC.
    lhs_blk = TM * KKC_pad * csize
    out_blk = TM * Cpad * 4
    fixed = KKC_pad * Cpad * csize + Cpad * 4
    vmem_limit = int(min(max(2 * (lhs_blk + out_blk) + fixed + (4 << 20),
                             16 << 20), 40 << 20))

    out = pl.pallas_call(
        kernel,
        out_shape=jax.ShapeDtypeStruct((M_pad, Cpad), jnp.float32),
        grid_spec=pltpu.PrefetchScalarGridSpec(
            num_scalar_prefetch=0,
            grid=(M_pad // TM,),
            in_specs=[
                pl.BlockSpec((TM, KKC_pad), lambda m: (m, 0)),
                pl.BlockSpec((KKC_pad, Cpad), lambda m: (0, 0)),
                pl.BlockSpec((1, Cpad), lambda m: (0, 0)),
            ],
            out_specs=pl.BlockSpec((TM, Cpad), lambda m: (m, 0)),
        ),
        compiler_params=pltpu.CompilerParams(
            dimension_semantics=("parallel",),
            vmem_limit_bytes=vmem_limit),
    )(cols, w_mat, b_vec)

    # Drop M/Cout padding, restore NCHW (slice/reshape/transpose fuse in XLA).
    out = out[:M_total, :Cout].reshape(N, H, W, Cout)
    return jnp.transpose(out, (0, 3, 1, 2))


if __name__ == "__main__":
    key = jax.random.PRNGKey(0)
    k_x, k_w, k_b = jax.random.split(key, 3)

    N, Cin, H, W = 2, 4, 16, 16
    Cout, K = 8, 3

    x = jax.random.normal(k_x, (N, Cin, H, W), dtype=jnp.float32)
    # Deterministic synthetic params (shapes match nn.Conv2d(Cin, Cout, 3, 1, 1)).
    weight = 0.1 * jax.random.normal(k_w, (Cout, Cin, K, K), dtype=jnp.float32)
    bias = 0.1 * jax.random.normal(k_b, (Cout,), dtype=jnp.float32)

    # Reference: XLA conv (same semantics as torch.nn.Conv2d with 'same' pad).
    conv_ref = lax.conv_general_dilated(
        x, weight, window_strides=(1, 1), padding=((1, 1), (1, 1)),
        dimension_numbers=("NCHW", "OIHW", "NCHW"))
    conv_ref = conv_ref + bias.reshape(1, Cout, 1, 1)
    ref_relu = jnp.maximum(conv_ref, 0.0)
    ref_selu = jax.nn.selu(conv_ref)

    # f32 MXU-operand path, ReLU (tight check).
    out_relu_f32 = conv2d_pallas(x, weight, bias, activation="relu",
                                 compute_dtype=jnp.float32)
    out_relu_f32 = jax.block_until_ready(out_relu_f32)
    assert out_relu_f32.shape == (N, Cout, H, W)
    assert jnp.allclose(out_relu_f32, ref_relu, atol=1e-4, rtol=1e-4)

    # f32 path, SELU (validates the EUP epilogue).
    out_selu_f32 = conv2d_pallas(x, weight, bias, activation="selu",
                                 compute_dtype=jnp.float32)
    out_selu_f32 = jax.block_until_ready(out_selu_f32)
    assert jnp.allclose(out_selu_f32, ref_selu, atol=1e-4, rtol=1e-4)

    # Default bf16 MXU-operand path (f32 accumulation), looser tolerance.
    out_relu_bf16 = conv2d_pallas(x, weight, bias, activation="relu")
    out_relu_bf16 = jax.block_until_ready(out_relu_bf16)
    assert out_relu_bf16.shape == (N, Cout, H, W)
    assert jnp.allclose(out_relu_bf16, ref_relu, atol=5e-2, rtol=5e-2)

    print("KERNEL_OK")
</pallas_src>

<mosaic_0001>
module attributes {stable_mosaic.version = 11 : i64} {
  func.func @_matmul_bias_act_kernel(%arg0: i32, %arg1: memref<128x128xf32, #tpu.memory_space<vmem>>, %arg2: memref<128x128xf32, #tpu.memory_space<vmem>>, %arg3: memref<1x128xf32, #tpu.memory_space<vmem>>, %arg4: memref<128x128xf32, #tpu.memory_space<vmem>>) attributes {dimension_semantics = [#tpu.dimension_semantics<parallel>], iteration_bounds = array<i64: 4>, scalar_prefetch = 0 : i64, scratch_operands = 0 : i64, tpu.core_type = #tpu.core_type<tc>, window_params = [{transform_indices = @transform_0, window_bounds = array<i64: 128, 128>}, {pipeline_mode = #tpu.pipeline_mode<synchronous>, transform_indices = @transform_1, window_bounds = array<i64: 128, 128>}, {pipeline_mode = #tpu.pipeline_mode<synchronous>, transform_indices = @transform_2, window_bounds = array<i64: 1, 128>}, {transform_indices = @transform_3, window_bounds = array<i64: 128, 128>}]} {
    %c0 = arith.constant 0 : index
    %c0_0 = arith.constant 0 : index
    %0 = vector.load %arg1[%c0, %c0_0] : memref<128x128xf32, #tpu.memory_space<vmem>>, vector<128x128xf32>
    %c0_1 = arith.constant 0 : index
    %c0_2 = arith.constant 0 : index
    %1 = vector.load %arg2[%c0_1, %c0_2] : memref<128x128xf32, #tpu.memory_space<vmem>>, vector<128x128xf32>
    %cst = arith.constant dense<0.000000e+00> : vector<128x128xf32>
    %2 = tpu.matmul %0, %1, %cst {dimension_numbers = #tpu.dot_dimension_numbers<[1], [0], [0], [1], [0, 0, 1, 1], [], []>} : vector<128x128xf32>, vector<128x128xf32>, vector<128x128xf32> -> vector<128x128xf32>
    %c0_3 = arith.constant 0 : index
    %c0_4 = arith.constant 0 : index
    %3 = vector.load %arg3[%c0_3, %c0_4] : memref<1x128xf32, #tpu.memory_space<vmem>>, vector<1x128xf32>
    %4 = vector.broadcast %3 : vector<1x128xf32> to vector<128x128xf32>
    %5 = arith.addf %2, %4 : vector<128x128xf32>
    %cst_5 = arith.constant 0.000000e+00 : f32
    %6 = vector.broadcast %cst_5 : f32 to vector<128x128xf32>
    %7 = arith.maximumf %5, %6 : vector<128x128xf32>
    %c0_6 = arith.constant 0 : index
    %c0_7 = arith.constant 0 : index
    %8 = vector.load %arg4[%c0_6, %c0_7] : memref<128x128xf32, #tpu.memory_space<vmem>>, vector<128x128xf32>
    tpu.vector_store %arg4[%c0_6, %c0_7], %7 {strides = array<i32>} : memref<128x128xf32, #tpu.memory_space<vmem>>, vector<128x128xf32>,
    return
  }
  func.func @transform_0(%arg0: i32) -> (i32, i32) {
    %c0_i32 = arith.constant 0 : i32
    %c0_i32_0 = arith.constant 0 : i32
    return %arg0, %c0_i32 : i32, i32
  }
  func.func @transform_1(%arg0: i32) -> (i32, i32) {
    %c0_i32 = arith.constant 0 : i32
    %c0_i32_0 = arith.constant 0 : i32
    %c0_i32_1 = arith.constant 0 : i32
    return %c0_i32, %c0_i32_0 : i32, i32
  }
  func.func @transform_2(%arg0: i32) -> (i32, i32) {
    %c0_i32 = arith.constant 0 : i32
    %c0_i32_0 = arith.constant 0 : i32
    %c0_i32_1 = arith.constant 0 : i32
    return %c0_i32, %c0_i32_0 : i32, i32
  }
  func.func @transform_3(%arg0: i32) -> (i32, i32) {
    %c0_i32 = arith.constant 0 : i32
    %c0_i32_0 = arith.constant 0 : i32
    return %arg0, %c0_i32 : i32, i32
  }
}

</mosaic_0001>

<bundles_post_ra>
// kernel: tpu_custom_call.1
= control target key start
LH: loop header
LB: loop body
LE: loop exit
PB: predicated region body
PF: predicated region fallthrough
CT: control target
= control target key end

     0   :  { %8 = vsyncpa [#allocation3], 0  ;;  %s1134_s0 = inlined_call_operand.hbm [shape: f32[512,128], index: 0, kind: input, shape index: {}]   ;;  %s1135_s1 = inlined_call_operand.hbm [shape: f32[128,128], index: 1, kind: input, shape index: {}]   ;;  %s1136_s2 = inlined_call_operand.vmem [shape: f32[1,128], index: 2, kind: input, shape index: {}]   ;;  %s1137_s3 = inlined_call_operand.hbm [shape: f32[512,128], index: 3, kind: output, shape index: {}]  }
   0x1   :  { %10 = vsyncpa [#allocation3 + $0x1], 0 }
   0x2   :  { %11 = vsyncpa [#allocation6], 0 }
   0x3   :  { %12 = vsyncpa [#allocation4], 0 }
   0x4   :  { %14 = vsyncpa [#allocation4 + $0x1], 0  ;;  %s892_s12 = smov 0   ;;  %s894_s13 = smov 0  }
   0x5   :  { %s896_s14 = smov 0   ;;  %s898_s15 = smov 0  }
   0x6 LB: > { %s913_s16 = sadd.s32 4294967295, %s863_s15   ;;  %s519_s17 = sadd.s32 4294967294, %s863_s15   ;;  %s863_s15 = sphi %s898_s15, %s1156_s15   ;;  %s859_s14 = sphi %s896_s14, %s1155_s14   ;;  %s855_s13 = sphi %s894_s13, %s1154_s13   ;;  %s851_s12 = sphi %s892_s12, %s1153_s12  }
   0x7   : > { %p40_p0 = scmp.ne.s32.totalorder %s855_s13, %s851_s12  ;;  %p1138_p1 = scmp.eq.s32.totalorder %s913_s16, 0 }
   0x8   : > { %p112_p3 = scmp.eq.s32.totalorder %s519_s17, 3  ;;  %p520_p5 = scmp.ge.s32.totalorder %s863_s15, 1 }
   0x9   : > { %p922_p4 = por %p1138_p1, %p40_p0  ;;  %p119_p7 = scmp.lt.s32.totalorder %s863_s15, 5 }
   0xa   : > { %p927_p6 = por %p112_p3, %p40_p0  ;;  %s865_s21 = smov [#allocation5]  }
   0xb   : > { %s1141_s18 = scalar_select %p922_p4, 1, 0 }
   0xc   : > { %s1142_s19 = scalar_select %p927_p6, 1, 0 }
   0xd   : > { %p932_p8 = pnand %p520_p5, %p119_p7  ;;  %s131_s22 = sshll.u32 %s865_s21, 4  ;;  %s132_s22 = int_to_ptr.vmem [resolvable:$true] %s131_s22 }
   0xe   : > { %s945_s24 = sadd.s32 1, %s863_s15   ;;  %s27_s25 = sadd.s32 1, %s859_s14 }
   0xf   : > { %s1143_s20 = scalar_select %p932_p8, 1, 0 }
  0x10   : > { %p682_p9 = pneg %p932_p8  ;;  %s24_s26 = ssub.s32 %s863_s15, %s945_s24 }
  0x11   : > { %s735_s29 = scalar_lea.hbm %s1135_s1, 2048 }
  0x12   : > { %p940_p10 = pnand %p682_p9, %p1138_p1  ;;  %p736_p11 = scmp.ne.s32.totalorder %s1135_s1, %s735_s29 }
  0x13   : > { %p742_p3 = scmp.lt.u32.totalorder %s735_s29, %s1135_s1 }
  0x14   : > { %p737_p12 = pneg %p940_p10 }
  0x16   : > { %p738_p13 = pnand %p737_p12, %p736_p11 }
  0x18   : > { %p739_p0 = pneg %p738_p13 }
  0x1a   : > { %p744_p5 = pnand %p742_p3, %p739_p0 }
  0x1c   : > { %747 = shalt.err (!%p744_p5)
}
  0x1d   : > { %s748_s7 = scalar_lea.vmem %s132_s22, 2048  ;;  %p756_p2 = scmp.lt.s32.totalorder %s132_s22, %s132_s22 }
  0x1e   : > { %p749_p7 = scmp.ne.s32.totalorder %s132_s22, %s748_s7  ;;  %p757_p6 = scmp.lt.s32.totalorder %s748_s7, %s748_s7 }
  0x20   : > { %p751_p9 = pnand %p749_p7, %p737_p12  ;;  %p758_p4 = por %p757_p6, %p756_p2 }
  0x22   : > { %p752_p1 = pneg %p751_p9 }
  0x24   : > { %p759_p8 = pnand %p758_p4, %p752_p1 }
  0x26   : > { %762 = shalt.err (!%p759_p8)
}
  0x27   : > { %s866_s8 = smov 128   ;;  %s867_s9 = smov 8  }
  0x28   : > { %685 = dma.hbm_to_vmem [thread:$0]  (!%p940_p10), %s1135_s1, 2048, %s132_s22, [#allocation6], %s866_s8, %s866_s8, %s867_s9  }
  0x29   : > { %p25_p1 = scmp.eq.s32.totalorder %s24_s26, 0  ;;  %p34_p2 = scmp.ne.s32.totalorder %s859_s14, %s855_s13 }
  0x2a   : > { %p35_p4 = scmp.eq.s32.totalorder %s863_s15, 0  ;;  %p695_p6 = scmp.lt.s32.totalorder %s863_s15, 4 }
  0x2b   : > { %s974_s17 = scalar_select %p25_p1, %s859_s14, %s27_s25  }
  0x2c   : > { %p36_p8 = por %p35_p4, %p34_p2  ;;  %p1145_p11 = scmp.eq.s32.totalorder %s913_s16, 3 }
  0x2d   : > { %s148_s23 = sand.u32 1, %s859_s14   ;;  %s536_s27 = sshll.u32 %s863_s15, 11 }
  0x2e   : > { %p978_p12 = por %p1145_p11, %p34_p2  ;;  %s523_s28 = sshll.u32 %s148_s23, 7 }
  0x2f   : > { %s987_s4 = scalar_lea.hbm %s1134_s0, %s536_s27  ;;  %s152_s22 = scalar_lea.vmem [#allocation2], %s523_s28 }
  0x30   : > { %s159_s25 = sshll.u32 %s152_s22, 4  ;;  %p989_p10 = pnand %p695_p6, %p36_p8  ;;  %s993_s25 = int_to_ptr.vmem [resolvable:$true] %s159_s25 }
  0x31   : > { %s995_s5 = scalar_lea.sflag [#allocation3], %s148_s23  ;;  %s763_s6 = scalar_lea.hbm %s987_s4, 2048 }
  0x32   : > { %p764_p13 = scmp.ne.s32.totalorder %s987_s4, %s763_s6  ;;  %p765_p0 = pneg %p989_p10 }
  0x33   : > { %s768_s11 = scalar_lea.hbm %s1134_s0, 8192  ;;  %p769_p7 = scmp.lt.u32.totalorder %s987_s4, %s1134_s0 }
  0x34   : > { %p766_p3 = pnand %p765_p0, %p764_p13  ;;  %p770_p9 = scmp.lt.u32.totalorder %s768_s11, %s763_s6 }
  0x35   : > { %p772_p2 = scmp.lt.u32.totalorder %s763_s6, %s987_s4 }
  0x36   : > { %p767_p5 = pneg %p766_p3  ;;  %p771_p1 = por %p770_p9, %p769_p7 }
  0x38   : > { %p773_p4 = por %p772_p2, %p771_p1 }
  0x3a   : > { %p774_p6 = pnand %p773_p4, %p767_p5 }
  0x3c   : > { %777 = shalt.err (!%p774_p6)
}
  0x3d   : > { %s778_s23 = scalar_lea.vmem %s993_s25, 2048  ;;  %s868_s29 = smov [#allocation2]  }
  0x3e   : > { %p779_p8 = scmp.ne.s32.totalorder %s993_s25, %s778_s23  ;;  %s783_s30 = sshll.u32 %s868_s29, 4  ;;  %s784_s30 = int_to_ptr.vmem [resolvable:$false] %s783_s30 }
  0x3f   : > { %s785_s22 = scalar_lea.vmem %s784_s30, 4096  ;;  %p786_p3 = scmp.lt.s32.totalorder %s993_s25, %s784_s30 }
  0x40   : > { %p781_p11 = pnand %p779_p8, %p765_p0  ;;  %p787_p7 = scmp.lt.s32.totalorder %s785_s22, %s778_s23 }
  0x42   : > { %p782_p13 = pneg %p781_p11  ;;  %p788_p9 = por %p787_p7, %p786_p3 }
  0x44   : > { %p789_p1 = pnand %p788_p9, %p782_p13 }
  0x46   : > { %792 = shalt.err (!%p789_p1)
}
  0x47   : > { %689 = dma.hbm_to_vmem [thread:$0]  (!%p989_p10), %s987_s4, 2048, %s993_s25, %s995_s5, %s866_s8, %s866_s8, %s867_s9  }
  0x48   : > { %p1148_p0 = scmp.ne.s32.totalorder %s1143_s20, 0 }
  0x49   : > { %s1029_s6 = sand.u32 (!%p1148_p0), 1, %s855_s13   ;;  %p1149_p5 = scmp.ne.s32.totalorder (!%p1148_p0), %s1141_s18, 0 }
  0x4a   : > { %171 = sbr.rel (%p1148_p0) target bundleno = 364 (0x16c), region = 32  ;;  %s527_s7 = sshll.u32 (!%p1148_p0), %s1029_s6, 7 }
  0x4b   : > { %s174_s10 = scalar_lea.sflag (!%p1148_p0), [#allocation3], %s1029_s6  ;;  %s1035_s26 = scalar_lea.vmem (!%p1148_p0), [#allocation2], %s527_s7 }
  0x51   : > { %838 = dma.done.wait (%p1149_p5), %s174_s10, 2048  }
  0x52   : > { %840 = vsyncadd (%p1149_p5), %s174_s10, 4294965248  ;;  %p1150_p10 = scmp.eq.s32.totalorder %s913_s16, 0 }
  0x54   : > { %842 = dma.done.wait (%p1150_p10), [#allocation6], 2048   ;;  %p1151_p2 = pmov %p1150_p10 }
  0x55   : > { %v222_v0 = vld [vmem:[#allocation5] sm:$0xff]  ;;  %v223_v1 = vld [vmem:[#allocation5 + $0x8] sm:$0xff]  ;;  %v224_v2 = vld [vmem:[#allocation5 + $0x10] sm:$0xff]  ;;  %s1066_s8 = scalar_lea.vmem [#allocation7], %s527_s7  ;;  %s537_s9 = sshll.u32 %s913_s16, 11 }
  0x56   : > { %844 = vsyncadd (%p1151_p2), [#allocation6], 4294965248  ;;  %v626_v3 = vpack.c.bf16 %v223_v1, %v222_v0  ;;  %v225_v4 = vld [vmem:[#allocation5 + $0x18] sm:$0xff]  ;;  %v226_v6 = vld [vmem:[#allocation5 + $0x20] sm:$0xff]  ;;  %s436_s4 = sshll.u32 %s1066_s8, 4  ;;  %s1085_s5 = scalar_lea.hbm %s1137_s3, %s537_s9  ;;  %s1087_s4 = int_to_ptr.vmem [resolvable:$true] %s436_s4 }
  0x57   : > { %v630_v5 = vpack.c.bf16 %v225_v4, %v224_v2  ;;  %v227_v7 = vld [vmem:[#allocation5 + $0x28] sm:$0xff]  ;;  %v206_v9 = vld [vmem:[%s1035_s26] sm:$0xff]  ;;  %v228_v11 = vld [vmem:[#allocation5 + $0x30] sm:$0xff]  ;;  %s423_s11 = scalar_lea.sflag [#allocation4], %s1029_s6  ;;  %s793_s27 = scalar_lea.vmem %s1087_s4, 2048 }
  0x58   : > { %627 = vmatprep.subr.bf16.mxu0 %v626_v3  ;;  %658 = vmatprep.subr.bf16.mxu1 %v626_v3  ;;  %v634_v8 = vpack.c.bf16 %v227_v7, %v226_v6  ;;  %v214_v10 = vld [vmem:[%s1035_s26 + $0x40] sm:$0xff]  ;;  %v229_v12 = vld [vmem:[#allocation5 + $0x38] sm:$0xff]  ;;  %v231_v15 = vld [vmem:[#allocation5 + $0x48] sm:$0xff]  ;;  %p794_p4 = scmp.ne.s32.totalorder %s1087_s4, %s793_s27  ;;  %s869_s28 = smov [#allocation7]  }
  0x59   : > { %629 = vmatpush3.bf16.msra.mxu0 %v626_v3  ;;  %666 = vmatpush3.bf16.msra.mxu1 %v626_v3  ;;  %v638_v13 = vpack.c.bf16 %v229_v12, %v228_v11  ;;  %v230_v14 = vld [vmem:[#allocation5 + $0x40] sm:$0xff]  ;;  %v232_v17 = vld [vmem:[#allocation5 + $0x50] sm:$0xff]  ;;  %v233_v18 = vld [vmem:[#allocation5 + $0x58] sm:$0xff]  ;;  %s797_s23 = sshll.u32 %s869_s28, 4  ;;  %s798_s23 = int_to_ptr.vmem [resolvable:$false] %s797_s23 }
  0x5a   : > { %631 = vmatprep.subr.bf16.mxu0 %v630_v5  ;;  %659 = vmatprep.subr.bf16.mxu1 %v630_v5  ;;  %v642_v16 = vpack.c.bf16 %v231_v15, %v230_v14  ;;  %v646_v19 = vpack.c.bf16 %v233_v18, %v232_v17  ;;  %v234_v20 = vld [vmem:[#allocation5 + $0x60] sm:$0xff]  ;;  %v235_v21 = vld [vmem:[#allocation5 + $0x68] sm:$0xff]  ;;  %v236_v23 = vld [vmem:[#allocation5 + $0x70] sm:$0xff]  ;;  %p795_p6 = pnand %p794_p4, %p978_p12  ;;  %s799_s29 = scalar_lea.vmem %s798_s23, 4096 }
  0x5b   : > { %602 = vmatprep.mubr.f32.mxu0 %v206_v9  ;;  %614 = vmatprep.mubr.f32.mxu1 %v214_v10  ;;  %v650_v22 = vpack.c.bf16 %v235_v21, %v234_v20  ;;  %v237_v24 = vld [vmem:[#allocation5 + $0x78] sm:$0xff]  ;;  %v207_v26 = vld [vmem:[%s1035_s26 + $0x8] sm:$0xff]  ;;  %v208_v28 = vld [vmem:[%s1035_s26 + $0x10] sm:$0xff]  ;;  %p800_p11 = scmp.lt.s32.totalorder %s1087_s4, %s798_s23  ;;  %p801_p13 = scmp.lt.s32.totalorder %s799_s29, %s793_s27 }
  0x5c   : > { %v654_v25 = vpack.c.bf16 %v237_v24, %v236_v23  ;;  %v215_v27 = vld [vmem:[%s1035_s26 + $0x48] sm:$0xff]  ;;  %v216_v29 = vld [vmem:[%s1035_s26 + $0x50] sm:$0xff]  ;;  %v209_v30 = vld [vmem:[%s1035_s26 + $0x18] sm:$0xff]  ;;  %p796_p8 = pneg %p795_p6 }
  0x5d   : > { %633 = vmatpush3.bf16.msra.mxu0 %v630_v5  ;;  %667 = vmatpush3.bf16.msra.mxu1 %v630_v5  ;;  %v217_v31 = vld [vmem:[%s1035_s26 + $0x58] sm:$0xff]  ;;  %v210_v32 = vld [vmem:[%s1035_s26 + $0x20] sm:$0xff]  ;;  %v211_v34 = vld [vmem:[%s1035_s26 + $0x28] sm:$0xff]  ;;  %p802_p3 = por %p801_p13, %p800_p11 }
  0x5e   : > { %635 = vmatprep.subr.bf16.mxu0 %v634_v8  ;;  %660 = vmatprep.subr.bf16.mxu1 %v634_v8  ;;  %v218_v33 = vld [vmem:[%s1035_s26 + $0x60] sm:$0xff]  ;;  %v219_v35 = vld [vmem:[%s1035_s26 + $0x68] sm:$0xff]  ;;  %v212_v36 = vld [vmem:[%s1035_s26 + $0x30] sm:$0xff] }
  0x5f   : > { %v220_v37 = vld [vmem:[%s1035_s26 + $0x70] sm:$0xff]  ;;  %v213_v38 = vld [vmem:[%s1035_s26 + $0x38] sm:$0xff]  ;;  %v530_v40 = vld [vmem:[%s1136_s2] ss:$0 sm:$0xff]  ;;  %p803_p7 = pnand %p802_p3, %p796_p8 }
  0x60   : > { %v221_v39 = vld [vmem:[%s1035_s26 + $0x78] sm:$0xff] }
  0x61   : > { %637 = vmatpush3.bf16.msra.mxu0 %v634_v8  ;;  %668 = vmatpush3.bf16.msra.mxu1 %v634_v8 }
  0x62   : > { %639 = vmatprep.subr.bf16.mxu0 %v638_v13  ;;  %661 = vmatprep.subr.bf16.mxu1 %v638_v13 }
  0x65   : > { %641 = vmatpush3.bf16.msra.mxu0 %v638_v13  ;;  %669 = vmatpush3.bf16.msra.mxu1 %v638_v13 }
  0x66   : > { %643 = vmatprep.subr.bf16.mxu0 %v642_v16  ;;  %662 = vmatprep.subr.bf16.mxu1 %v642_v16 }
  0x69   : > { %645 = vmatpush3.bf16.msra.mxu0 %v642_v16  ;;  %670 = vmatpush3.bf16.msra.mxu1 %v642_v16 }
  0x6a   : > { %647 = vmatprep.subr.bf16.mxu0 %v646_v19  ;;  %663 = vmatprep.subr.bf16.mxu1 %v646_v19 }
  0x6d   : > { %649 = vmatpush3.bf16.msra.mxu0 %v646_v19  ;;  %671 = vmatpush3.bf16.msra.mxu1 %v646_v19 }
  0x6e   : > { %651 = vmatprep.subr.bf16.mxu0 %v650_v22  ;;  %664 = vmatprep.subr.bf16.mxu1 %v650_v22 }
  0x71   : > { %653 = vmatpush3.bf16.msra.mxu0 %v650_v22  ;;  %672 = vmatpush3.bf16.msra.mxu1 %v650_v22 }
  0x72   : > { %655 = vmatprep.subr.bf16.mxu0 %v654_v25  ;;  %665 = vmatprep.subr.bf16.mxu1 %v654_v25 }
  0x75   : > { %657 = vmatpush3.bf16.msra.mxu0 %v654_v25  ;;  %673 = vmatpush3.bf16.msra.mxu1 %v654_v25 }
  0x78   : > { %603 = vmatmul.mubr.f32.vlgmr.msra.gmra.mrb[0].mxu0 %v207_v26  ;;  %615 = vmatmul.mubr.f32.vlgmr.msra.gmra.mrb[0].mxu1 %v215_v27 }
  0x79   : > { %605 = vmatprep.mubr.f32.mxu0 %v208_v28  ;;  %617 = vmatprep.mubr.f32.mxu1 %v216_v29 }
  0x7c   : > { %606 = vmatmul.mubr.f32.gmra.mrb[2].mxu0 %v209_v30  ;;  %618 = vmatmul.mubr.f32.gmra.mrb[2].mxu1 %v217_v31 }
  0x7d   : > { %608 = vmatprep.mubr.f32.mxu0 %v210_v32  ;;  %620 = vmatprep.mubr.f32.mxu1 %v218_v33 }
  0x80   : > { %609 = vmatmul.mubr.f32.gmra.mrb[4].mxu0 %v211_v34  ;;  %621 = vmatmul.mubr.f32.gmra.mrb[4].mxu1 %v219_v35 }
  0x81   : > { %611 = vmatprep.mubr.f32.mxu0 %v212_v36  ;;  %623 = vmatprep.mubr.f32.mxu1 %v220_v37 }
  0x84   : > { %612 = vmatmul.mubr.f32.gmra.mrb[6].mxu0 %v213_v38  ;;  %624 = vmatmul.mubr.f32.gmra.mrb[6].mxu1 %v221_v39 }
 0x14b   : > { %v604_v41 = vpop.f32.mrb[0].mxu0  ;;  %v616_v42 = vpop.f32.mrb[0].mxu1 }
 0x14c   : > { %v317_v43 = vadd.f32 %v604_v41, %v530_v40  ;;  %v357_v44 = vadd.f32 %v616_v42, %v530_v40  ;;  %v311_v45 = vpop.f32.mrb[1].mxu0  ;;  %v351_v46 = vpop.f32.mrb[1].mxu1 }
 0x14d   : > { %v312_v47 = vadd.f32 %v530_v40, %v311_v45  ;;  %v352_v48 = vadd.f32 %v530_v40, %v351_v46 }
 0x14e   : > { %v391_v49 = vmax.f32 %v317_v43, 0.0  ;;  %v399_v50 = vmax.f32 %v357_v44, 0.0 }
 0x14f   : > { %v390_v51 = vmax.f32 %v312_v47, 0.0  ;;  %v398_v52 = vmax.f32 %v352_v48, 0.0  ;;  %v607_v53 = vpop.f32.mrb[2].mxu0  ;;  %v619_v54 = vpop.f32.mrb[2].mxu1 }
 0x150   : > { %407 = vst [vmem:[%s1066_s8 + $0x8] sm:$0xff] %v391_v49  ;;  %415 = vst [vmem:[%s1066_s8 + $0x48] sm:$0xff] %v399_v50  ;;  %v327_v55 = vadd.f32 %v607_v53, %v530_v40  ;;  %v367_v56 = vadd.f32 %v619_v54, %v530_v40  ;;  %v321_v57 = vpop.f32.mrb[3].mxu0  ;;  %v361_v58 = vpop.f32.mrb[3].mxu1 }
 0x151   : > { %406 = vst [vmem:[%s1066_s8] sm:$0xff] %v390_v51  ;;  %414 = vst [vmem:[%s1066_s8 + $0x40] sm:$0xff] %v398_v52  ;;  %v322_v59 = vadd.f32 %v530_v40, %v321_v57  ;;  %v362_v60 = vadd.f32 %v530_v40, %v361_v58 }
 0x152   : > { %v393_v61 = vmax.f32 %v327_v55, 0.0  ;;  %v401_v62 = vmax.f32 %v367_v56, 0.0 }
 0x153   : > { %v392_v63 = vmax.f32 %v322_v59, 0.0  ;;  %v400_v0 = vmax.f32 %v362_v60, 0.0  ;;  %v610_v1 = vpop.f32.mrb[4].mxu0  ;;  %v622_v2 = vpop.f32.mrb[4].mxu1 }
 0x154   : > { %409 = vst [vmem:[%s1066_s8 + $0x18] sm:$0xff] %v393_v61  ;;  %417 = vst [vmem:[%s1066_s8 + $0x58] sm:$0xff] %v401_v62  ;;  %v337_v3 = vadd.f32 %v610_v1, %v530_v40  ;;  %v377_v4 = vadd.f32 %v622_v2, %v530_v40  ;;  %v331_v5 = vpop.f32.mrb[5].mxu0  ;;  %v371_v6 = vpop.f32.mrb[5].mxu1 }
 0x155   : > { %408 = vst [vmem:[%s1066_s8 + $0x10] sm:$0xff] %v392_v63  ;;  %416 = vst [vmem:[%s1066_s8 + $0x50] sm:$0xff] %v400_v0  ;;  %v332_v7 = vadd.f32 %v530_v40, %v331_v5  ;;  %v372_v8 = vadd.f32 %v530_v40, %v371_v6 }
 0x156   : > { %v395_v9 = vmax.f32 %v337_v3, 0.0  ;;  %v403_v10 = vmax.f32 %v377_v4, 0.0 }
 0x157   : > { %v394_v11 = vmax.f32 %v332_v7, 0.0  ;;  %v402_v12 = vmax.f32 %v372_v8, 0.0  ;;  %v613_v13 = vpop.f32.mrb[6].mxu0  ;;  %v625_v14 = vpop.f32.mrb[6].mxu1 }
 0x158   : > { %411 = vst [vmem:[%s1066_s8 + $0x28] sm:$0xff] %v395_v9  ;;  %419 = vst [vmem:[%s1066_s8 + $0x68] sm:$0xff] %v403_v10  ;;  %v347_v15 = vadd.f32 %v613_v13, %v530_v40  ;;  %v387_v16 = vadd.f32 %v625_v14, %v530_v40  ;;  %v341_v17 = vpop.f32.mrb[7].mxu0  ;;  %v381_v18 = vpop.f32.mrb[7].mxu1 }
 0x159   : > { %410 = vst [vmem:[%s1066_s8 + $0x20] sm:$0xff] %v394_v11  ;;  %418 = vst [vmem:[%s1066_s8 + $0x60] sm:$0xff] %v402_v12  ;;  %v342_v19 = vadd.f32 %v530_v40, %v341_v17  ;;  %v382_v20 = vadd.f32 %v530_v40, %v381_v18 }
 0x15a   : > { %v397_v21 = vmax.f32 %v347_v15, 0.0  ;;  %v405_v22 = vmax.f32 %v387_v16, 0.0 }
 0x15b   : > { %v396_v23 = vmax.f32 %v342_v19, 0.0  ;;  %v404_v24 = vmax.f32 %v382_v20, 0.0 }
 0x15c   : > { %413 = vst [vmem:[%s1066_s8 + $0x38] sm:$0xff] %v397_v21  ;;  %421 = vst [vmem:[%s1066_s8 + $0x78] sm:$0xff] %v405_v22 }
 0x15d   : > { %412 = vst [vmem:[%s1066_s8 + $0x30] sm:$0xff] %v396_v23  ;;  %420 = vst [vmem:[%s1066_s8 + $0x70] sm:$0xff] %v404_v24 }
 0x15e   : > { %806 = shalt.err (!%p803_p7)
}
 0x15f   : > { %s807_s30 = scalar_lea.hbm %s1085_s5, 2048  ;;  %s811_s10 = scalar_lea.hbm %s1137_s3, 8192 }
 0x160   : > { %p808_p9 = scmp.ne.s32.totalorder %s1085_s5, %s807_s30  ;;  %p812_p5 = scmp.lt.u32.totalorder %s1085_s5, %s1137_s3 }
 0x161   : > { %p813_p10 = scmp.lt.u32.totalorder %s811_s10, %s807_s30  ;;  %p815_p4 = scmp.lt.u32.totalorder %s807_s30, %s1085_s5 }
 0x162   : > { %p809_p1 = pnand %p808_p9, %p978_p12 }
 0x163   : > { %p814_p2 = por %p813_p10, %p812_p5 }
 0x164   : > { %p810_p0 = pneg %p809_p1 }
 0x165   : > { %p816_p6 = por %p815_p4, %p814_p2 }
 0x167   : > { %p817_p8 = pnand %p816_p6, %p810_p0 }
 0x169   : > { %820 = shalt.err (!%p817_p8)
}
 0x16a   : > { %s870_s20 = smov 128   ;;  %s871_s8 = smov 8  }
 0x16b   : > { %680 = dma.vmem_to_hbm [thread:$0]  (%p978_p12), %s1087_s4, 2048, %s1085_s5, %s423_s11, %s870_s20, %s870_s20, %s871_s8  }
 0x16c PF: > { %p697_p11 = scmp.ge.s32.totalorder %s863_s15, 2  ;;  %s451_s9 = sand.u32 1, %s851_s12  }
 0x16d   : > { %p1152_p13 = scmp.ne.s32.totalorder %s1142_s19, 0  ;;  %s452_s16 = scalar_lea.sflag [#allocation4], %s451_s9 }
 0x16f   : > { %p691_p3 = pnand %p697_p11, %p1152_p13 }
 0x171   : > { %846 = dma.done.wait (!%p691_p3), %s452_s16, 2048  }
 0x172   : > { %848 = vsyncadd (!%p691_p3), %s452_s16, 4294965248  ;;  %p17_p7 = scmp.ge.s32.totalorder %s945_s24, 6   ;;  %s1153_s12 = smov %s855_s13 }
 0x173   : > { %s1154_s13 = smov %s859_s14  ;;  %s1155_s14 = smov %s974_s17 }
 0x174   : > { %s1156_s15 = smov %s945_s24  ;;  %19 = sbr.rel (!%p17_p7) target bundleno = 6 (0x6), region = 81 }
 0x17b   :  { %457 = vsyncpa [#allocation3], 1 }
 0x17c   :  { %459 = vsyncpa [#allocation3 + $0x1], 1 }
 0x17d   :  { %460 = vsyncpa [#allocation6], 1 }
 0x17e   :  { %461 = vsyncpa [#allocation4], 1 }
 0x17f   :  { %463 = vsyncpa [#allocation4 + $0x1], 1 }

</bundles_post_ra>
